<compile_context>
chip_gen: v7x
topology: tpu7x:2x2x1
jax: 0.10.0
libtpu: 0.0.40
codegen_flags: <defaults>
</compile_context>

<pallas_src>
import functools

import jax
import jax.numpy as jnp
from jax.experimental import pallas as pl
from jax.experimental.pallas import tpu as pltpu

BETA_MIN = 1e-6
_MXU_MIN_C = 8                 # route C >= 8 through the MXU (review item 1)
_TARGET_TILE_BYTES = 2 << 20   # ~2 MiB of activations per grid step (item 2)
_MIN_GRID_STEPS = 4            # keep both v7x TensorCores busy (item 4)
_MAX_BATCH_UNROLL = 8          # cap the static batch unroll in the MXU kernel


def _round_up(v, m):
    return ((v + m - 1) // m) * m


def _ensure_min_grid_steps(n, b_blk, m_total, m_blk, m_align, min_steps):
    """Shrink the batch block first, then the pixel block, until the grid has
    at least `min_steps` steps (so v7x's 2 TensorCores both get work)."""
    while pl.cdiv(n, b_blk) * pl.cdiv(m_total, m_blk) < min_steps:
        if b_blk > 1:
            b_blk = max(1, (b_blk + 1) // 2)
        elif m_blk > m_align:
            new_blk = max(m_align, _round_up(m_blk // 2, m_align))
            if new_blk >= m_blk:
                break
            m_blk = new_blk
        else:
            break
    return b_blk, m_blk


def _sigdn_small_c_kernel(gamma_ref, beta_ref, x_ref, o_ref, *, c):
    """C < 8 path: channel contraction as scalar*slab FMAs on the VPU.

    gamma_ref: (C, C) f32 in SMEM (already clamped, (out_ch, in_ch) order)
    beta_ref:  (C,)   f32 in SMEM (already clamped)
    x_ref/o_ref: (b_blk, C, s_blk, 128) -- pixels fill BOTH the sublane and
    lane axes, so vregs are fully packed even for tiny C.
    """
    x = x_ref[...]
    ax = jnp.abs(x).astype(jnp.float32)          # single f32 temp (no xf copy)
    for i in range(c):
        norm = beta_ref[i] + gamma_ref[i, 0] * ax[:, 0]
        for j in range(1, c):
            norm = norm + gamma_ref[i, j] * ax[:, j]
        o_ref[:, i, :, :] = (x[:, i].astype(jnp.float32) * norm).astype(o_ref.dtype)


def _sigdn_kernel(gamma_ref, beta_ref, x_ref, o_ref, *, b_blk, c, use_mxu):
    """General path.

    gamma_ref: (C, C) in VMEM, clamped, (out_ch, in_ch) order; bf16 when the
               activations are bf16 (MXU-native), else f32.
    beta_ref:  (C, 1) f32 in VMEM.
    x_ref/o_ref: (b_blk, C, tile_m), pixels lane-dense on the last axis.
    """
    gamma = gamma_ref[...]
    beta = beta_ref[...]
    for b in range(b_blk):                       # static unroll, independent items
        xb = x_ref[b]                            # (C, tile_m) in input dtype
        axb = jnp.abs(xb)
        if use_mxu:
            # norm[i, m] = sum_j gamma[i, j] * |x[j, m]|   (MXU, f32 accumulate)
            norm = jnp.dot(gamma, axb, preferred_element_type=jnp.float32) + beta
        else:
            axf = axb.astype(jnp.float32)
            acc = gamma[:, 0:1] * axf[0:1, :]
            for j in range(1, c):
                acc = acc + gamma[:, j:j + 1] * axf[j:j + 1, :]
            norm = acc + beta
        o_ref[b] = (xb.astype(jnp.float32) * norm).astype(o_ref.dtype)


def simplified_inverse_gdn(image, gamma, beta, *, beta_min=BETA_MIN,
                           target_tile_bytes=_TARGET_TILE_BYTES,
                           min_grid_steps=_MIN_GRID_STEPS):
    """image: (N, C, H, W); gamma: (C, C, 1, 1); beta: (C,). Returns (N, C, H, W)."""
    n, c, h, w = image.shape
    hw = h * w
    itemsize = jnp.dtype(image.dtype).itemsize
    total_bytes = n * c * hw * itemsize

    # Parameter clamps hoisted out of the kernel (done once, in f32 so beta_min
    # never underflows).
    gamma_f32 = jnp.maximum(gamma.reshape(c, c).astype(jnp.float32), 0.0)
    beta_f32 = jnp.maximum(beta.astype(jnp.float32), beta_min)

    flops = n * hw * (2 * c * c + 3 * c)
    bytes_accessed = 2 * n * c * hw * itemsize + (c * c + c) * 4
    cost = pl.CostEstimate(flops=flops, transcendentals=0,
                           bytes_accessed=bytes_accessed)

    small_c = (c < _MXU_MIN_C) and (hw % 128 == 0)

    if small_c:
        # ---- sublane-packed VPU path: x viewed as (N, C, hw/128, 128) --------
        sublane = 8 * max(1, 4 // itemsize)       # 8 f32 / 16 bf16 / 32 int8
        s_total = hw // 128
        unit = c * 128 * itemsize                 # bytes of one (1,C,1,128) sliver
        if s_total * unit <= target_tile_bytes:
            s_blk = s_total
            b_blk = int(max(1, min(n, target_tile_bytes // max(1, s_total * unit))))
        else:
            b_blk = 1
            s_blk = int(min(s_total,
                            max(sublane,
                                (target_tile_bytes // unit) // sublane * sublane)))
        if total_bytes >= (1 << 20):
            b_blk, s_blk = _ensure_min_grid_steps(n, b_blk, s_total, s_blk,
                                                  sublane, min_grid_steps)
        grid = (pl.cdiv(n, b_blk), pl.cdiv(s_total, s_blk))

        blk_in = b_blk * c * s_blk * 128 * itemsize
        blk_f32 = b_blk * c * s_blk * 128 * 4
        needed = 4 * blk_in + 3 * blk_f32 + 2 * (c * c + c) * 4
        vmem_limit = int(min(48 << 20, max(8 << 20, needed * 3 // 2 + (2 << 20))))

        x4 = image.reshape(n, c, s_total, 128)
        kernel = functools.partial(_sigdn_small_c_kernel, c=c)
        out4 = pl.pallas_call(
            kernel,
            out_shape=jax.ShapeDtypeStruct((n, c, s_total, 128), image.dtype),
            grid_spec=pltpu.PrefetchScalarGridSpec(
                num_scalar_prefetch=0,
                grid=grid,
                in_specs=[
                    pl.BlockSpec(memory_space=pltpu.MemorySpace.SMEM),   # gamma
                    pl.BlockSpec(memory_space=pltpu.MemorySpace.SMEM),   # beta
                    pl.BlockSpec((b_blk, c, s_blk, 128),
                                 lambda bb, mm: (bb, 0, mm, 0)),
                ],
                out_specs=pl.BlockSpec((b_blk, c, s_blk, 128),
                                       lambda bb, mm: (bb, 0, mm, 0)),
            ),
            compiler_params=pltpu.CompilerParams(
                dimension_semantics=("parallel", "parallel"),
                vmem_limit_bytes=vmem_limit,
            ),
            cost_estimate=cost,
        )(gamma_f32, beta_f32, x4)
        return out4.reshape(n, c, h, w)

    # ---- general path: (N, C, H*W) blocks, MXU for C >= 8 --------------------
    use_mxu = c >= _MXU_MIN_C
    if use_mxu and image.dtype == jnp.bfloat16:
        gamma_op = gamma_f32.astype(jnp.bfloat16)   # bf16-native MXU, f32 acc
    else:
        gamma_op = gamma_f32
    beta_col = beta_f32.reshape(c, 1)

    row_bytes = c * itemsize                        # bytes per pixel (all channels)
    if hw * row_bytes <= target_tile_bytes:
        tile_m = hw
        b_blk = int(max(1, min(n, _MAX_BATCH_UNROLL,
                               target_tile_bytes // max(1, hw * row_bytes))))
    else:
        b_blk = 1
        tile_m = int(min(hw, max(128,
                                 (target_tile_bytes // row_bytes) // 128 * 128)))
    if total_bytes >= (1 << 20):
        b_blk, tile_m = _ensure_min_grid_steps(n, b_blk, hw, tile_m, 128,
                                               min_grid_steps)
    grid = (pl.cdiv(n, b_blk), pl.cdiv(hw, tile_m))

    blk_in = b_blk * c * tile_m * itemsize
    blk_f32 = c * tile_m * 4                        # per-item f32 temporaries
    param_bytes = c * c * jnp.dtype(gamma_op.dtype).itemsize + c * 4
    needed = 4 * blk_in + 3 * blk_f32 + 2 * param_bytes
    vmem_limit = int(min(48 << 20, max(8 << 20, needed * 3 // 2 + (2 << 20))))

    x3 = image.reshape(n, c, hw)
    kernel = functools.partial(_sigdn_kernel, b_blk=b_blk, c=c, use_mxu=use_mxu)
    out3 = pl.pallas_call(
        kernel,
        out_shape=jax.ShapeDtypeStruct((n, c, hw), image.dtype),
        grid_spec=pltpu.PrefetchScalarGridSpec(
            num_scalar_prefetch=0,
            grid=grid,
            in_specs=[
                pl.BlockSpec((c, c), lambda bb, mm: (0, 0)),      # gamma (resident)
                pl.BlockSpec((c, 1), lambda bb, mm: (0, 0)),      # beta  (resident)
                pl.BlockSpec((b_blk, c, tile_m), lambda bb, mm: (bb, 0, mm)),
            ],
            out_specs=pl.BlockSpec((b_blk, c, tile_m), lambda bb, mm: (bb, 0, mm)),
        ),
        compiler_params=pltpu.CompilerParams(
            dimension_semantics=("parallel", "parallel"),
            vmem_limit_bytes=vmem_limit,
        ),
        cost_estimate=cost,
    )(gamma_op, beta_col, x3)
    return out3.reshape(n, c, h, w)


def _reference(image, gamma, beta, beta_min=BETA_MIN):
    """Pure-JAX reference of the PyTorch forward."""
    c = image.shape[1]
    g = jnp.maximum(gamma.reshape(c, c), 0.0)
    b = jnp.maximum(beta, beta_min)
    norm = jnp.einsum("ij,njhw->nihw", g, jnp.abs(image)) + b[None, :, None, None]
    return image * norm


if __name__ == "__main__":
    key = jax.random.PRNGKey(0)
    gamma_init = 0.1

    # --- primary check: module-sized inputs (C=4 -> sublane-packed VPU path) ---
    N, C, H, W = 2, 4, 16, 16
    k1, k2, k3, k4 = jax.random.split(key, 4)
    x = jax.random.normal(k1, (N, C, H, W), dtype=jnp.float32)
    gamma = (jnp.eye(C, dtype=jnp.float32) * gamma_init
             + 0.01 * jax.random.normal(k2, (C, C), dtype=jnp.float32)
             ).reshape(C, C, 1, 1)
    beta = jnp.ones((C,), dtype=jnp.float32) \
        + 0.01 * jax.random.normal(k3, (C,), dtype=jnp.float32)

    out = jax.block_until_ready(simplified_inverse_gdn(x, gamma, beta))
    ref = _reference(x, gamma, beta)
    assert out.shape == (N, C, H, W)
    assert jnp.allclose(out, ref, atol=1e-5, rtol=1e-5), "small-C path mismatch"

    # --- secondary check: C=16 exercises the MXU path (looser tolerance since
    # MXU default precision may use bf16 passes for f32 operands) ---
    N2, C2, H2, W2 = 2, 16, 8, 8
    k5, k6, k7 = jax.random.split(k4, 3)
    x2 = jax.random.normal(k5, (N2, C2, H2, W2), dtype=jnp.float32)
    gamma2 = (jnp.eye(C2, dtype=jnp.float32) * gamma_init
              + 0.01 * jax.random.normal(k6, (C2, C2), dtype=jnp.float32)
              ).reshape(C2, C2, 1, 1)
    beta2 = jnp.ones((C2,), dtype=jnp.float32) \
        + 0.01 * jax.random.normal(k7, (C2,), dtype=jnp.float32)

    out2 = jax.block_until_ready(simplified_inverse_gdn(x2, gamma2, beta2))
    ref2 = _reference(x2, gamma2, beta2)
    assert out2.shape == (N2, C2, H2, W2)
    assert jnp.allclose(out2, ref2, atol=2e-2, rtol=2e-2), "MXU path mismatch"

    print("KERNEL_OK")
</pallas_src>

<mosaic_0001>
module attributes {stable_mosaic.version = 11 : i64} {
  func.func @_sigdn_small_c_kernel(%arg0: i32, %arg1: i32, %arg2: memref<4x4xf32, #tpu.memory_space<smem>>, %arg3: memref<4xf32, #tpu.memory_space<smem>>, %arg4: memref<2x4x2x128xf32, #tpu.memory_space<vmem>>, %arg5: memref<2x4x2x128xf32, #tpu.memory_space<vmem>>) attributes {dimension_semantics = [#tpu.dimension_semantics<parallel>, #tpu.dimension_semantics<parallel>], iteration_bounds = array<i64: 1, 1>, scalar_prefetch = 0 : i64, scratch_operands = 0 : i64, tpu.core_type = #tpu.core_type<tc>, window_params = [{transform_indices = @transform_0, window_bounds = array<i64: 4, 4>}, {transform_indices = @transform_1, window_bounds = array<i64: 4>}, {transform_indices = @transform_2, window_bounds = array<i64: 2, 4, 2, 128>}, {transform_indices = @transform_3, window_bounds = array<i64: 2, 4, 2, 128>}]} {
    %c0 = arith.constant 0 : index
    %c0_0 = arith.constant 0 : index
    %c0_1 = arith.constant 0 : index
    %c0_2 = arith.constant 0 : index
    %0 = vector.load %arg4[%c0, %c0_0, %c0_1, %c0_2] : memref<2x4x2x128xf32, #tpu.memory_space<vmem>>, vector<2x4x2x128xf32>
    %1 = math.absf %0 : vector<2x4x2x128xf32>
    %c0_3 = arith.constant 0 : index
    %2 = memref.load %arg3[%c0_3] : memref<4xf32, #tpu.memory_space<smem>>
    %c0_4 = arith.constant 0 : index
    %c0_5 = arith.constant 0 : index
    %3 = memref.load %arg2[%c0_4, %c0_5] : memref<4x4xf32, #tpu.memory_space<smem>>
    %4 = vector.extract_strided_slice %1 {offsets = [0, 0, 0, 0], sizes = [2, 1, 2, 128], strides = [1, 1, 1, 1]} : vector<2x4x2x128xf32> to vector<2x1x2x128xf32>
    %5 = vector.shape_cast %4 : vector<2x1x2x128xf32> to vector<2x2x128xf32>
    %6 = vector.broadcast %3 : f32 to vector<2x2x128xf32>
    %7 = arith.mulf %6, %5 : vector<2x2x128xf32>
    %8 = vector.broadcast %2 : f32 to vector<2x2x128xf32>
    %9 = arith.addf %8, %7 : vector<2x2x128xf32>
    %c0_6 = arith.constant 0 : index
    %c1 = arith.constant 1 : index
    %10 = memref.load %arg2[%c0_6, %c1] : memref<4x4xf32, #tpu.memory_space<smem>>
    %11 = vector.extract_strided_slice %1 {offsets = [0, 1, 0, 0], sizes = [2, 1, 2, 128], strides = [1, 1, 1, 1]} : vector<2x4x2x128xf32> to vector<2x1x2x128xf32>
    %12 = vector.shape_cast %11 : vector<2x1x2x128xf32> to vector<2x2x128xf32>
    %13 = vector.broadcast %10 : f32 to vector<2x2x128xf32>
    %14 = arith.mulf %13, %12 : vector<2x2x128xf32>
    %15 = arith.addf %9, %14 : vector<2x2x128xf32>
    %c0_7 = arith.constant 0 : index
    %c2 = arith.constant 2 : index
    %16 = memref.load %arg2[%c0_7, %c2] : memref<4x4xf32, #tpu.memory_space<smem>>
    %17 = vector.extract_strided_slice %1 {offsets = [0, 2, 0, 0], sizes = [2, 1, 2, 128], strides = [1, 1, 1, 1]} : vector<2x4x2x128xf32> to vector<2x1x2x128xf32>
    %18 = vector.shape_cast %17 : vector<2x1x2x128xf32> to vector<2x2x128xf32>
    %19 = vector.broadcast %16 : f32 to vector<2x2x128xf32>
    %20 = arith.mulf %19, %18 : vector<2x2x128xf32>
    %21 = arith.addf %15, %20 : vector<2x2x128xf32>
    %c0_8 = arith.constant 0 : index
    %c3 = arith.constant 3 : index
    %22 = memref.load %arg2[%c0_8, %c3] : memref<4x4xf32, #tpu.memory_space<smem>>
    %23 = vector.extract_strided_slice %1 {offsets = [0, 3, 0, 0], sizes = [2, 1, 2, 128], strides = [1, 1, 1, 1]} : vector<2x4x2x128xf32> to vector<2x1x2x128xf32>
    %24 = vector.shape_cast %23 : vector<2x1x2x128xf32> to vector<2x2x128xf32>
    %25 = vector.broadcast %22 : f32 to vector<2x2x128xf32>
    %26 = arith.mulf %25, %24 : vector<2x2x128xf32>
    %27 = arith.addf %21, %26 : vector<2x2x128xf32>
    %28 = vector.extract_strided_slice %0 {offsets = [0, 0, 0, 0], sizes = [2, 1, 2, 128], strides = [1, 1, 1, 1]} : vector<2x4x2x128xf32> to vector<2x1x2x128xf32>
    %29 = vector.shape_cast %28 : vector<2x1x2x128xf32> to vector<2x2x128xf32>
    %30 = arith.mulf %29, %27 : vector<2x2x128xf32>
    %c0_9 = arith.constant 0 : index
    %c0_10 = arith.constant 0 : index
    %c0_11 = arith.constant 0 : index
    %c0_12 = arith.constant 0 : index
    %31 = vector.load %arg5[%c0_9, %c0_10, %c0_11, %c0_12] : memref<2x4x2x128xf32, #tpu.memory_space<vmem>>, vector<2x1x2x128xf32>
    %32 = vector.shape_cast %31 : vector<2x1x2x128xf32> to vector<2x2x128xf32>
    %33 = vector.shape_cast %30 : vector<2x2x128xf32> to vector<2x1x2x128xf32>
    tpu.vector_store %arg5[%c0_9, %c0_10, %c0_11, %c0_12], %33 {strides = array<i32>} : memref<2x4x2x128xf32, #tpu.memory_space<vmem>>, vector<2x1x2x128xf32>,
    %c1_13 = arith.constant 1 : index
    %34 = memref.load %arg3[%c1_13] : memref<4xf32, #tpu.memory_space<smem>>
    %c1_14 = arith.constant 1 : index
    %c0_15 = arith.constant 0 : index
    %35 = memref.load %arg2[%c1_14, %c0_15] : memref<4x4xf32, #tpu.memory_space<smem>>
    %36 = vector.extract_strided_slice %1 {offsets = [0, 0, 0, 0], sizes = [2, 1, 2, 128], strides = [1, 1, 1, 1]} : vector<2x4x2x128xf32> to vector<2x1x2x128xf32>
    %37 = vector.shape_cast %36 : vector<2x1x2x128xf32> to vector<2x2x128xf32>
    %38 = vector.broadcast %35 : f32 to vector<2x2x128xf32>
    %39 = arith.mulf %38, %37 : vector<2x2x128xf32>
    %40 = vector.broadcast %34 : f32 to vector<2x2x128xf32>
    %41 = arith.addf %40, %39 : vector<2x2x128xf32>
    %c1_16 = arith.constant 1 : index
    %c1_17 = arith.constant 1 : index
    %42 = memref.load %arg2[%c1_16, %c1_17] : memref<4x4xf32, #tpu.memory_space<smem>>
    %43 = vector.extract_strided_slice %1 {offsets = [0, 1, 0, 0], sizes = [2, 1, 2, 128], strides = [1, 1, 1, 1]} : vector<2x4x2x128xf32> to vector<2x1x2x128xf32>
    %44 = vector.shape_cast %43 : vector<2x1x2x128xf32> to vector<2x2x128xf32>
    %45 = vector.broadcast %42 : f32 to vector<2x2x128xf32>
    %46 = arith.mulf %45, %44 : vector<2x2x128xf32>
    %47 = arith.addf %41, %46 : vector<2x2x128xf32>
    %c1_18 = arith.constant 1 : index
    %c2_19 = arith.constant 2 : index
    %48 = memref.load %arg2[%c1_18, %c2_19] : memref<4x4xf32, #tpu.memory_space<smem>>
    %49 = vector.extract_strided_slice %1 {offsets = [0, 2, 0, 0], sizes = [2, 1, 2, 128], strides = [1, 1, 1, 1]} : vector<2x4x2x128xf32> to vector<2x1x2x128xf32>
    %50 = vector.shape_cast %49 : vector<2x1x2x128xf32> to vector<2x2x128xf32>
    %51 = vector.broadcast %48 : f32 to vector<2x2x128xf32>
    %52 = arith.mulf %51, %50 : vector<2x2x128xf32>
    %53 = arith.addf %47, %52 : vector<2x2x128xf32>
    %c1_20 = arith.constant 1 : index
    %c3_21 = arith.constant 3 : index
    %54 = memref.load %arg2[%c1_20, %c3_21] : memref<4x4xf32, #tpu.memory_space<smem>>
    %55 = vector.extract_strided_slice %1 {offsets = [0, 3, 0, 0], sizes = [2, 1, 2, 128], strides = [1, 1, 1, 1]} : vector<2x4x2x128xf32> to vector<2x1x2x128xf32>
    %56 = vector.shape_cast %55 : vector<2x1x2x128xf32> to vector<2x2x128xf32>
    %57 = vector.broadcast %54 : f32 to vector<2x2x128xf32>
    %58 = arith.mulf %57, %56 : vector<2x2x128xf32>
    %59 = arith.addf %53, %58 : vector<2x2x128xf32>
    %60 = vector.extract_strided_slice %0 {offsets = [0, 1, 0, 0], sizes = [2, 1, 2, 128], strides = [1, 1, 1, 1]} : vector<2x4x2x128xf32> to vector<2x1x2x128xf32>
    %61 = vector.shape_cast %60 : vector<2x1x2x128xf32> to vector<2x2x128xf32>
    %62 = arith.mulf %61, %59 : vector<2x2x128xf32>
    %c0_22 = arith.constant 0 : index
    %c1_23 = arith.constant 1 : index
    %c0_24 = arith.constant 0 : index
    %c0_25 = arith.constant 0 : index
    %63 = vector.load %arg5[%c0_22, %c1_23, %c0_24, %c0_25] : memref<2x4x2x128xf32, #tpu.memory_space<vmem>>, vector<2x1x2x128xf32>
    %64 = vector.shape_cast %63 : vector<2x1x2x128xf32> to vector<2x2x128xf32>
    %65 = vector.shape_cast %62 : vector<2x2x128xf32> to vector<2x1x2x128xf32>
    tpu.vector_store %arg5[%c0_22, %c1_23, %c0_24, %c0_25], %65 {strides = array<i32>} : memref<2x4x2x128xf32, #tpu.memory_space<vmem>>, vector<2x1x2x128xf32>,
    %c2_26 = arith.constant 2 : index
    %66 = memref.load %arg3[%c2_26] : memref<4xf32, #tpu.memory_space<smem>>
    %c2_27 = arith.constant 2 : index
    %c0_28 = arith.constant 0 : index
    %67 = memref.load %arg2[%c2_27, %c0_28] : memref<4x4xf32, #tpu.memory_space<smem>>
    %68 = vector.extract_strided_slice %1 {offsets = [0, 0, 0, 0], sizes = [2, 1, 2, 128], strides = [1, 1, 1, 1]} : vector<2x4x2x128xf32> to vector<2x1x2x128xf32>
    %69 = vector.shape_cast %68 : vector<2x1x2x128xf32> to vector<2x2x128xf32>
    %70 = vector.broadcast %67 : f32 to vector<2x2x128xf32>
    %71 = arith.mulf %70, %69 : vector<2x2x128xf32>
    %72 = vector.broadcast %66 : f32 to vector<2x2x128xf32>
    %73 = arith.addf %72, %71 : vector<2x2x128xf32>
    %c2_29 = arith.constant 2 : index
    %c1_30 = arith.constant 1 : index
    %74 = memref.load %arg2[%c2_29, %c1_30] : memref<4x4xf32, #tpu.memory_space<smem>>
    %75 = vector.extract_strided_slice %1 {offsets = [0, 1, 0, 0], sizes = [2, 1, 2, 128], strides = [1, 1, 1, 1]} : vector<2x4x2x128xf32> to vector<2x1x2x128xf32>
    %76 = vector.shape_cast %75 : vector<2x1x2x128xf32> to vector<2x2x128xf32>
    %77 = vector.broadcast %74 : f32 to vector<2x2x128xf32>
    %78 = arith.mulf %77, %76 : vector<2x2x128xf32>
    %79 = arith.addf %73, %78 : vector<2x2x128xf32>
    %c2_31 = arith.constant 2 : index
    %c2_32 = arith.constant 2 : index
    %80 = memref.load %arg2[%c2_31, %c2_32] : memref<4x4xf32, #tpu.memory_space<smem>>
    %81 = vector.extract_strided_slice %1 {offsets = [0, 2, 0, 0], sizes = [2, 1, 2, 128], strides = [1, 1, 1, 1]} : vector<2x4x2x128xf32> to vector<2x1x2x128xf32>
    %82 = vector.shape_cast %81 : vector<2x1x2x128xf32> to vector<2x2x128xf32>
    %83 = vector.broadcast %80 : f32 to vector<2x2x128xf32>
    %84 = arith.mulf %83, %82 : vector<2x2x128xf32>
    %85 = arith.addf %79, %84 : vector<2x2x128xf32>
    %c2_33 = arith.constant 2 : index
    %c3_34 = arith.constant 3 : index
    %86 = memref.load %arg2[%c2_33, %c3_34] : memref<4x4xf32, #tpu.memory_space<smem>>
    %87 = vector.extract_strided_slice %1 {offsets = [0, 3, 0, 0], sizes = [2, 1, 2, 128], strides = [1, 1, 1, 1]} : vector<2x4x2x128xf32> to vector<2x1x2x128xf32>
    %88 = vector.shape_cast %87 : vector<2x1x2x128xf32> to vector<2x2x128xf32>
    %89 = vector.broadcast %86 : f32 to vector<2x2x128xf32>
    %90 = arith.mulf %89, %88 : vector<2x2x128xf32>
    %91 = arith.addf %85, %90 : vector<2x2x128xf32>
    %92 = vector.extract_strided_slice %0 {offsets = [0, 2, 0, 0], sizes = [2, 1, 2, 128], strides = [1, 1, 1, 1]} : vector<2x4x2x128xf32> to vector<2x1x2x128xf32>
    %93 = vector.shape_cast %92 : vector<2x1x2x128xf32> to vector<2x2x128xf32>
    %94 = arith.mulf %93, %91 : vector<2x2x128xf32>
    %c0_35 = arith.constant 0 : index
    %c2_36 = arith.constant 2 : index
    %c0_37 = arith.constant 0 : index
    %c0_38 = arith.constant 0 : index
    %95 = vector.load %arg5[%c0_35, %c2_36, %c0_37, %c0_38] : memref<2x4x2x128xf32, #tpu.memory_space<vmem>>, vector<2x1x2x128xf32>
    %96 = vector.shape_cast %95 : vector<2x1x2x128xf32> to vector<2x2x128xf32>
    %97 = vector.shape_cast %94 : vector<2x2x128xf32> to vector<2x1x2x128xf32>
    tpu.vector_store %arg5[%c0_35, %c2_36, %c0_37, %c0_38], %97 {strides = array<i32>} : memref<2x4x2x128xf32, #tpu.memory_space<vmem>>, vector<2x1x2x128xf32>,
    %c3_39 = arith.constant 3 : index
    %98 = memref.load %arg3[%c3_39] : memref<4xf32, #tpu.memory_space<smem>>
    %c3_40 = arith.constant 3 : index
    %c0_41 = arith.constant 0 : index
    %99 = memref.load %arg2[%c3_40, %c0_41] : memref<4x4xf32, #tpu.memory_space<smem>>
    %100 = vector.extract_strided_slice %1 {offsets = [0, 0, 0, 0], sizes = [2, 1, 2, 128], strides = [1, 1, 1, 1]} : vector<2x4x2x128xf32> to vector<2x1x2x128xf32>
    %101 = vector.shape_cast %100 : vector<2x1x2x128xf32> to vector<2x2x128xf32>
    %102 = vector.broadcast %99 : f32 to vector<2x2x128xf32>
    %103 = arith.mulf %102, %101 : vector<2x2x128xf32>
    %104 = vector.broadcast %98 : f32 to vector<2x2x128xf32>
    %105 = arith.addf %104, %103 : vector<2x2x128xf32>
    %c3_42 = arith.constant 3 : index
    %c1_43 = arith.constant 1 : index
    %106 = memref.load %arg2[%c3_42, %c1_43] : memref<4x4xf32, #tpu.memory_space<smem>>
    %107 = vector.extract_strided_slice %1 {offsets = [0, 1, 0, 0], sizes = [2, 1, 2, 128], strides = [1, 1, 1, 1]} : vector<2x4x2x128xf32> to vector<2x1x2x128xf32>
    %108 = vector.shape_cast %107 : vector<2x1x2x128xf32> to vector<2x2x128xf32>
    %109 = vector.broadcast %106 : f32 to vector<2x2x128xf32>
    %110 = arith.mulf %109, %108 : vector<2x2x128xf32>
    %111 = arith.addf %105, %110 : vector<2x2x128xf32>
    %c3_44 = arith.constant 3 : index
    %c2_45 = arith.constant 2 : index
    %112 = memref.load %arg2[%c3_44, %c2_45] : memref<4x4xf32, #tpu.memory_space<smem>>
    %113 = vector.extract_strided_slice %1 {offsets = [0, 2, 0, 0], sizes = [2, 1, 2, 128], strides = [1, 1, 1, 1]} : vector<2x4x2x128xf32> to vector<2x1x2x128xf32>
    %114 = vector.shape_cast %113 : vector<2x1x2x128xf32> to vector<2x2x128xf32>
    %115 = vector.broadcast %112 : f32 to vector<2x2x128xf32>
    %116 = arith.mulf %115, %114 : vector<2x2x128xf32>
    %117 = arith.addf %111, %116 : vector<2x2x128xf32>
    %c3_46 = arith.constant 3 : index
    %c3_47 = arith.constant 3 : index
    %118 = memref.load %arg2[%c3_46, %c3_47] : memref<4x4xf32, #tpu.memory_space<smem>>
    %119 = vector.extract_strided_slice %1 {offsets = [0, 3, 0, 0], sizes = [2, 1, 2, 128], strides = [1, 1, 1, 1]} : vector<2x4x2x128xf32> to vector<2x1x2x128xf32>
    %120 = vector.shape_cast %119 : vector<2x1x2x128xf32> to vector<2x2x128xf32>
    %121 = vector.broadcast %118 : f32 to vector<2x2x128xf32>
    %122 = arith.mulf %121, %120 : vector<2x2x128xf32>
    %123 = arith.addf %117, %122 : vector<2x2x128xf32>
    %124 = vector.extract_strided_slice %0 {offsets = [0, 3, 0, 0], sizes = [2, 1, 2, 128], strides = [1, 1, 1, 1]} : vector<2x4x2x128xf32> to vector<2x1x2x128xf32>
    %125 = vector.shape_cast %124 : vector<2x1x2x128xf32> to vector<2x2x128xf32>
    %126 = arith.mulf %125, %123 : vector<2x2x128xf32>
    %c0_48 = arith.constant 0 : index
    %c3_49 = arith.constant 3 : index
    %c0_50 = arith.constant 0 : index
    %c0_51 = arith.constant 0 : index
    %127 = vector.load %arg5[%c0_48, %c3_49, %c0_50, %c0_51] : memref<2x4x2x128xf32, #tpu.memory_space<vmem>>, vector<2x1x2x128xf32>
    %128 = vector.shape_cast %127 : vector<2x1x2x128xf32> to vector<2x2x128xf32>
    %129 = vector.shape_cast %126 : vector<2x2x128xf32> to vector<2x1x2x128xf32>
    tpu.vector_store %arg5[%c0_48, %c3_49, %c0_50, %c0_51], %129 {strides = array<i32>} : memref<2x4x2x128xf32, #tpu.memory_space<vmem>>, vector<2x1x2x128xf32>,
    return
  }
  func.func @transform_0(%arg0: i32, %arg1: i32) -> (i32, i32) {
    %c0_i32 = arith.constant 0 : i32
    %c0_i32_0 = arith.constant 0 : i32
    %c0_i32_1 = arith.constant 0 : i32
    return %c0_i32, %c0_i32_0 : i32, i32
  }
  func.func @transform_1(%arg0: i32, %arg1: i32) -> i32 {
    %c0_i32 = arith.constant 0 : i32
    %c0_i32_0 = arith.constant 0 : i32
    return %c0_i32 : i32
  }
  func.func @transform_2(%arg0: i32, %arg1: i32) -> (i32, i32, i32, i32) {
    %c0_i32 = arith.constant 0 : i32
    %c0_i32_0 = arith.constant 0 : i32
    %c0_i32_1 = arith.constant 0 : i32
    return %arg0, %c0_i32, %arg1, %c0_i32_0 : i32, i32, i32, i32
  }
  func.func @transform_3(%arg0: i32, %arg1: i32) -> (i32, i32, i32, i32) {
    %c0_i32 = arith.constant 0 : i32
    %c0_i32_0 = arith.constant 0 : i32
    %c0_i32_1 = arith.constant 0 : i32
    return %arg0, %c0_i32, %arg1, %c0_i32_0 : i32, i32, i32, i32
  }
}

</mosaic_0001>

<bundles_post_ra>
// kernel: tpu_custom_call.1
= control target key start
LH: loop header
LB: loop body
LE: loop exit
PB: predicated region body
PF: predicated region fallthrough
CT: control target
= control target key end

     0   :  { %8 = vsyncpa [#allocation5], 0  ;;  %s513_s0 = inlined_call_operand.hbm [shape: f32[4,4], index: 0, kind: input, shape index: {}]   ;;  %s514_s1 = inlined_call_operand.vmem [shape: f32[4], index: 1, kind: input, shape index: {}]   ;;  %s515_s2 = inlined_call_operand.hbm [shape: f32[2,4,2,128], index: 2, kind: input, shape index: {}]   ;;  %s516_s3 = inlined_call_operand.hbm [shape: f32[2,4,2,128], index: 3, kind: output, shape index: {}]  }
   0x1   :  { %9 = vsyncpa [#allocation6], 0 }
   0x2   :  { %10 = vsyncpa [#allocation3], 0 }
   0x3   :  { %11 = vsyncpa [#allocation4], 0  ;;  %s26_s14 = sshll.u32 %s514_s1, 4  ;;  %s234_s17 = scalar_lea.hbm %s513_s0, 64  ;;  %s27_s14 = int_to_ptr.vmem [resolvable:$true] %s26_s14 }
   0x4   :  { %p235_p0 = scmp.ne.s32.totalorder %s513_s0, %s234_s17  ;;  %p238_p1 = scmp.lt.u32.totalorder %s234_s17, %s513_s0 }
   0x6   :  { %p240_p2 = pnand %p238_p1, %p235_p0 }
   0x8   :  { %243 = shalt.err (!%p240_p2)
}
   0x9   :  { %s308_s22 = smov [#allocation2]   ;;  %s244_s1 = scalar_lea.vmem %s27_s14, 16 }
   0xa   :  { %19 = dma.hbm_to_smem %s513_s0, 64, %s308_s22, [#allocation5]  }
   0xb   :  { %p245_p3 = scmp.ne.s32.totalorder %s27_s14, %s244_s1  ;;  %p249_p4 = scmp.lt.s32.totalorder %s27_s14, %s27_s14 }
   0xc   :  { %p250_p5 = scmp.lt.s32.totalorder %s244_s1, %s244_s1 }
   0xe   :  { %p251_p6 = por %p250_p5, %p249_p4 }
  0x10   :  { %p252_p7 = pnand %p251_p6, %p245_p3 }
  0x12   :  { %255 = shalt.err (!%p252_p7)
}
  0x13   :  { %s309_s25 = smov [#allocation7]   ;;  %s310_s26 = smov [#allocation8]  }
  0x14   :  { %29 = dma.vmem_to_smem %s27_s14, 16, %s309_s25, [#allocation6]  }
  0x15   :  { %s35_s27 = sshll.u32 %s310_s26, 4  ;;  %s256_s30 = scalar_lea.hbm %s515_s2, 256  ;;  %s36_s27 = int_to_ptr.vmem [resolvable:$true] %s35_s27 }
  0x16   :  { %p257_p8 = scmp.ne.s32.totalorder %s515_s2, %s256_s30  ;;  %p260_p9 = scmp.lt.u32.totalorder %s256_s30, %s515_s2 }
  0x18   :  { %p262_p10 = pnand %p260_p9, %p257_p8 }
  0x1a   :  { %265 = shalt.err (!%p262_p10)
}
  0x1b   :  { %s266_s7 = scalar_lea.vmem %s36_s27, 256  ;;  %p271_p12 = scmp.lt.s32.totalorder %s36_s27, %s36_s27 }
  0x1c   :  { %p267_p11 = scmp.ne.s32.totalorder %s36_s27, %s266_s7  ;;  %p272_p13 = scmp.lt.s32.totalorder %s266_s7, %s266_s7 }
  0x1e   :  { %p273_p0 = por %p272_p13, %p271_p12 }
  0x20   :  { %p274_p1 = pnand %p273_p0, %p267_p11 }
  0x22   :  { %277 = shalt.err (!%p274_p1)
}
  0x23   :  { %s311_s8 = smov 32   ;;  %s312_s9 = smov 2  }
  0x24   :  { %41 = dma.hbm_to_vmem [thread:$0]  %s515_s2, 256, %s36_s27, [#allocation3], %s311_s8, %s311_s8, %s312_s9  }
  0x25   :  { %300 = dma.done.wait [#allocation5], 64  }
  0x26   :  { %301 = vsyncadd [#allocation5], 4294967232 }
  0x27   :  { %302 = dma.done.wait [#allocation6], 16  }
  0x28   :  { %303 = vsyncadd [#allocation6], 4294967280 }
  0x29   :  { %304 = dma.done.wait [#allocation3], 256  }
  0x2a   :  { %305 = vsyncadd [#allocation3], 4294967040 }
  0x2b   :  { %51 = sfence }
  0x2c   :  { %v364_v0 = vld [vmem:[#allocation8] sm:$0x3]  ;;  %v366_v1 = vld [vmem:[#allocation8 + $0x2] sm:$0x3]  ;;  %v368_v2 = vld [vmem:[#allocation8 + $0x4] sm:$0x3] }
  0x2d   :  { %v370_v3 = vld [vmem:[#allocation8 + $0x6] sm:$0x3]  ;;  %v373_v4 = vand.u32 2147483647, %v364_v0  ;;  %s375_s12 = sld [smem:[#allocation7]]  ;;  %s210_s13 = sld [smem:[#allocation2 + $0x1]] }
  0x2e   :  { %s69_s2 = sld [smem:[#allocation2]]  ;;  %v377_v5 = vld [vmem:[#allocation8 + $0x8] sm:$0x3]  ;;  %s379_s14 = sld [smem:[#allocation2 + $0x2]]  ;;  %v383_v6 = vld [vmem:[#allocation8 + $0xa] sm:$0x3] }
  0x2f   :  { %s381_s15 = sld [smem:[#allocation2 + $0x3]]  ;;  %v386_v7 = vand.u32 2147483647, %v366_v1  ;;  %v389_v8 = vand.u32 2147483647, %v368_v2  ;;  %s404_s16 = sld [smem:[#allocation7 + $0x1]] }
  0x30   :  { %v391_v9 = vld [vmem:[#allocation8 + $0xc] sm:$0x3]  ;;  %v394_v10 = vand.u32 2147483647, %v370_v3  ;;  %v396_v11 = vld [vmem:[#allocation8 + $0xe] sm:$0x3] }
  0x31   :  { %v399_v12 = vand.u32 2147483647, %v377_v5  ;;  %v402_v13 = vand.u32 2147483647, %v383_v6  ;;  %s406_s17 = sld [smem:[#allocation2 + $0x80]]  ;;  %s411_s18 = sld [smem:[#allocation2 + $0x81]] }
  0x32   :  { %v409_v14 = vand.u32 2147483647, %v391_v9  ;;  %s413_s19 = sld [smem:[#allocation2 + $0x82]]  ;;  %v417_v18 = vand.u32 2147483647, %v396_v11  ;;  %s419_s20 = sld [smem:[#allocation2 + $0x83]] }
  0x33   :  { %v73_v16 = vstv %s375_s12  ;;  %v77_v17 = vstv %s210_s13  ;;  %s425_s21 = sld [smem:[#allocation2 + $0x100]]  ;;  %s429_s22 = sld [smem:[#allocation7 + $0x2]] }
  0x34   :  { %v70_v15 = vstv %s69_s2  ;;  %v78_v20 = vmul.f32 %v77_v17, %v386_v7  ;;  %v83_v21 = vstv %s379_s14  ;;  %v79_v24 = vmul.f32 %v77_v17, %v402_v13  ;;  %s431_s23 = sld [smem:[#allocation2 + $0x101]]  ;;  %s439_s24 = sld [smem:[#allocation2 + $0x102]] }
  0x35   :  { %v71_v19 = vmul.f32 %v70_v15, %v373_v4  ;;  %v89_v22 = vstv %s381_s15  ;;  %v72_v23 = vmul.f32 %v70_v15, %v399_v12  ;;  %v84_v26 = vmul.f32 %v83_v21, %v389_v8  ;;  %s441_s1 = sld [smem:[#allocation2 + $0x103]]  ;;  %s451_s25 = sld [smem:[#allocation2 + $0x180]] }
  0x36   :  { %v90_v27 = vmul.f32 %v89_v22, %v394_v10  ;;  %v85_v28 = vmul.f32 %v83_v21, %v409_v14  ;;  %v91_v30 = vmul.f32 %v89_v22, %v417_v18  ;;  %v103_v32 = vstv %s404_s16  ;;  %s456_s26 = sld [smem:[#allocation7 + $0x3]]  ;;  %s458_s27 = sld [smem:[#allocation2 + $0x181]] }
  0x37   :  { %v74_v25 = vadd.f32 %v73_v16, %v71_v19  ;;  %v75_v29 = vadd.f32 %v73_v16, %v72_v23  ;;  %v100_v31 = vstv %s406_s17  ;;  %v107_v35 = vstv %s411_s18  ;;  %s461_s28 = sld [smem:[#allocation2 + $0x182]]  ;;  %s463_s29 = sld [smem:[#allocation2 + $0x183]] }
  0x38   :  { %v101_v34 = vmul.f32 %v100_v31, %v373_v4  ;;  %v113_v36 = vstv %s413_s19  ;;  %v108_v38 = vmul.f32 %v107_v35, %v386_v7  ;;  %v119_v40 = vstv %s419_s20  ;;  %s313_s30 = smov [#allocation9]  }
  0x39   :  { %v80_v33 = vadd.f32 %v78_v20, %v74_v25  ;;  %v81_v37 = vadd.f32 %v79_v24, %v75_v29  ;;  %v114_v39 = vmul.f32 %v113_v36, %v389_v8  ;;  %v120_v43 = vmul.f32 %v119_v40, %v394_v10  ;;  %s196_s4 = sshll.u32 %s313_s30, 4  ;;  %s197_s4 = int_to_ptr.vmem [resolvable:$true] %s196_s4 }
  0x3a   :  { %v104_v42 = vadd.f32 %v103_v32, %v101_v34  ;;  %v102_v44 = vmul.f32 %v100_v31, %v399_v12  ;;  %v109_v46 = vmul.f32 %v107_v35, %v402_v13  ;;  %v115_v47 = vmul.f32 %v113_v36, %v409_v14  ;;  %s278_s5 = scalar_lea.vmem %s197_s4, 256  ;;  %p283_p3 = scmp.lt.s32.totalorder %s197_s4, %s197_s4 }
  0x3b   :  { %v86_v41 = vadd.f32 %v84_v26, %v80_v33  ;;  %v87_v45 = vadd.f32 %v85_v28, %v81_v37  ;;  %v121_v48 = vmul.f32 %v119_v40, %v417_v18  ;;  %v131_v52 = vstv %s425_s21  ;;  %p279_p2 = scmp.ne.s32.totalorder %s197_s4, %s278_s5  ;;  %p284_p4 = scmp.lt.s32.totalorder %s278_s5, %s278_s5 }
  0x3c   :  { %v110_v50 = vadd.f32 %v108_v38, %v104_v42  ;;  %v105_v51 = vadd.f32 %v103_v32, %v102_v44  ;;  %v132_v54 = vmul.f32 %v131_v52, %v373_v4  ;;  %v134_v55 = vstv %s429_s22 }
  0x3d   :  { %v92_v49 = vadd.f32 %v90_v27, %v86_v41  ;;  %v93_v53 = vadd.f32 %v91_v30, %v87_v45  ;;  %v138_v56 = vstv %s431_s23  ;;  %v144_v63 = vstv %s439_s24  ;;  %p285_p5 = por %p284_p4, %p283_p3 }
  0x3e   :  { %v116_v58 = vadd.f32 %v114_v39, %v110_v50  ;;  %v111_v59 = vadd.f32 %v109_v46, %v105_v51  ;;  %v139_v60 = vmul.f32 %v138_v56, %v386_v7  ;;  %v135_v62 = vadd.f32 %v134_v55, %v132_v54 }
  0x3f   :  { %v94_v57 = vmul.f32 %v92_v49, %v364_v0  ;;  %v95_v61 = vmul.f32 %v93_v53, %v377_v5  ;;  %v150_v15 = vstv %s441_s1  ;;  %v145_v19 = vmul.f32 %v144_v63, %v389_v8  ;;  %p286_p6 = pnand %p285_p5, %p279_p2 }
  0x40   :  { %v122_v16 = vadd.f32 %v120_v43, %v116_v58  ;;  %v117_v17 = vadd.f32 %v115_v47, %v111_v59  ;;  %v151_v20 = vmul.f32 %v150_v15, %v394_v10  ;;  %v141_v0 = vadd.f32 %v139_v60, %v135_v62 }
  0x41   :  { %96 = vst [vmem:[#allocation9] sm:$0x3] %v94_v57  ;;  %97 = vst [vmem:[#allocation9 + $0x8] sm:$0x3] %v95_v61  ;;  %v133_v21 = vmul.f32 %v131_v52, %v399_v12  ;;  %v140_v5 = vmul.f32 %v138_v56, %v402_v13  ;;  %v146_v22 = vmul.f32 %v144_v63, %v409_v14  ;;  %v162_v26 = vstv %s451_s25 }
  0x42   :  { %v124_v23 = vmul.f32 %v122_v16, %v366_v1  ;;  %v123_v24 = vadd.f32 %v121_v48, %v117_v17  ;;  %v152_v25 = vmul.f32 %v150_v15, %v417_v18  ;;  %v147_v27 = vadd.f32 %v145_v19, %v141_v0 }
  0x43   :  { %v136_v28 = vadd.f32 %v134_v55, %v133_v21  ;;  %v163_v29 = vmul.f32 %v162_v26, %v373_v4  ;;  %v165_v30 = vstv %s456_s26  ;;  %v169_v32 = vstv %s458_s27 }
  0x44   :  { %127 = vst [vmem:[#allocation9 + $0x2] sm:$0x3] %v124_v23  ;;  %v125_v31 = vmul.f32 %v123_v24, %v383_v6  ;;  %v175_v33 = vstv %s461_s28  ;;  %v181_v34 = vstv %s463_s29  ;;  %v153_v35 = vadd.f32 %v151_v20, %v147_v27 }
  0x45   :  { %v142_v36 = vadd.f32 %v140_v5, %v136_v28  ;;  %v166_v37 = vadd.f32 %v165_v30, %v163_v29  ;;  %v170_v1 = vmul.f32 %v169_v32, %v386_v7  ;;  %v176_v38 = vmul.f32 %v175_v33, %v389_v8 }
  0x46   :  { %128 = vst [vmem:[#allocation9 + $0xa] sm:$0x3] %v125_v31  ;;  %v164_v39 = vmul.f32 %v162_v26, %v399_v12  ;;  %v171_v40 = vmul.f32 %v169_v32, %v402_v13  ;;  %v155_v4 = vmul.f32 %v153_v35, %v368_v2  ;;  %v182_v6 = vmul.f32 %v181_v34, %v394_v10 }
  0x47   :  { %v148_v41 = vadd.f32 %v146_v22, %v142_v36  ;;  %v172_v42 = vadd.f32 %v170_v1, %v166_v37  ;;  %v177_v44 = vmul.f32 %v175_v33, %v409_v14  ;;  %v183_v47 = vmul.f32 %v181_v34, %v417_v18 }
  0x48   :  { %v167_v43 = vadd.f32 %v165_v30, %v164_v39  ;;  %158 = vst [vmem:[#allocation9 + $0x4] sm:$0x3] %v155_v4 }
  0x49   :  { %v154_v45 = vadd.f32 %v152_v25, %v148_v41  ;;  %v178_v46 = vadd.f32 %v176_v38, %v172_v42 }
  0x4a   :  { %v173_v7 = vadd.f32 %v171_v40, %v167_v43 }
  0x4b   :  { %v156_v8 = vmul.f32 %v154_v45, %v391_v9  ;;  %v184_v12 = vadd.f32 %v182_v6, %v178_v46 }
  0x4c   :  { %v179_v48 = vadd.f32 %v177_v44, %v173_v7 }
  0x4d   :  { %159 = vst [vmem:[#allocation9 + $0xc] sm:$0x3] %v156_v8  ;;  %v186_v2 = vmul.f32 %v184_v12, %v370_v3 }
  0x4e   :  { %v185_v13 = vadd.f32 %v183_v47, %v179_v48 }
  0x4f   :  { %189 = vst [vmem:[#allocation9 + $0x6] sm:$0x3] %v186_v2 }
  0x50   :  { %v187_v10 = vmul.f32 %v185_v13, %v396_v11 }
  0x52   :  { %190 = vst [vmem:[#allocation9 + $0xe] sm:$0x3] %v187_v10 }
  0x53   :  { %289 = shalt.err (!%p286_p6)
}
  0x54   :  { %s290_s7 = scalar_lea.hbm %s516_s3, 256 }
  0x55   :  { %p291_p7 = scmp.ne.s32.totalorder %s516_s3, %s290_s7  ;;  %p294_p8 = scmp.lt.u32.totalorder %s290_s7, %s516_s3 }
  0x57   :  { %p296_p9 = pnand %p294_p8, %p291_p7 }
  0x59   :  { %299 = shalt.err (!%p296_p9)
}
  0x5a   :  { %202 = dma.vmem_to_hbm [thread:$0]  %s197_s4, 256, %s516_s3, [#allocation4], %s311_s8, %s311_s8, %s312_s9  }
  0x5b   :  { %306 = dma.done.wait [#allocation4], 256  }
  0x5c   :  { %307 = vsyncadd [#allocation4], 4294967040 }
  0x5d   :  { %206 = vsyncpa [#allocation3], 1 }
  0x5e   :  { %207 = vsyncpa [#allocation4], 1 }
  0x5f   :  { %208 = vsyncpa [#allocation5], 1 }
  0x60   :  { %209 = vsyncpa [#allocation6], 1 }

</bundles_post_ra>
